<compile_context>
chip_gen: v6e
topology: v6e:2x2x1
jax: 0.10.0
libtpu: 0.0.40
codegen_flags: <defaults>
</compile_context>

<pallas_src>
import jax
import jax.numpy as jnp
from jax.experimental import pallas as pl
from jax.experimental.pallas import tpu as pltpu

_LANES = 128
_SUBLANES_I16 = 16  # min sublane tile for int16 inputs


def _tree_sum(terms):
    """Pairwise sum so the VPU terms are independent (no serial chain)."""
    terms = list(terms)
    while len(terms) > 1:
        nxt = [terms[i] + terms[i + 1] for i in range(0, len(terms) - 1, 2)]
        if len(terms) % 2:
            nxt.append(terms[-1])
        terms = nxt
    return terms[0]


def _composition_kernel_factory(n_types: int, n_targets: int):
    """Kernel with the (static, small) species and target counts unrolled."""
    # TODO(synk): for very large species counts (K >~ 64) switch the static
    # unroll to a bounded-unroll lax.fori_loop to keep vreg pressure flat.

    def kernel(atomic_types_ref, weights_ref, types_ref, out_ref):
        # atomic_types_ref: SMEM int32   [K]                (scalar prefetch)
        # weights_ref:      SMEM float32 [T, K]             (scalar prefetch)
        # types_ref:        VMEM int16   [TILE_R, 128]      (one atom tile)
        # out_ref:          VMEM float32 [T, TILE_R, 128]   (same atom tile)
        types = types_ref[...].astype(jnp.int32)            # widen once, in-reg
        # Species masks: computed once per atom tile, reused for every target.
        masks = [types == atomic_types_ref[k] for k in range(n_types)]
        zero = jnp.zeros(types.shape, jnp.float32)
        for t in range(n_targets):
            terms = [
                jnp.where(masks[k], weights_ref[t, k], zero)
                for k in range(n_types)
            ]
            out_ref[t, :, :] = _tree_sum(terms)

    return kernel


def composition_forward(
    concatenated_types,
    atomic_types,
    weights,
    *,
    tile_rows: int = 2048,
    return_padded: bool = False,
):
    """Per-atom composition energies.

    concatenated_types: int [N]        atom species for all atoms of all systems
    atomic_types:       int [K]        sorted known species
    weights:            float [T, K]   composition weights per target

    Returns float32 [T, N] (or the padded [T, n_pad] slab if return_padded):
        out[t, i] = weights[t, index_of(types[i])], 0.0 for unknown species.
    """
    n_atoms = int(concatenated_types.shape[0])
    n_targets, n_types = weights.shape

    # --- lane-dense layout: atoms -> [rows, 128] int16, rows tiled by TILE_R ---
    rows = max(1, -(-n_atoms // _LANES))
    rows_rounded = -(-rows // _SUBLANES_I16) * _SUBLANES_I16
    tile_rows = -(-int(tile_rows) // _SUBLANES_I16) * _SUBLANES_I16
    tile_rows = max(_SUBLANES_I16, min(tile_rows, rows_rounded))
    rows_padded = -(-rows_rounded // tile_rows) * tile_rows
    n_pad = rows_padded * _LANES
    n_tiles = rows_padded // tile_rows

    # -1 sentinel matches no real atomic number -> padded slots contribute 0.
    types_padded = jnp.pad(
        concatenated_types.astype(jnp.int16),
        (0, n_pad - n_atoms),
        constant_values=-1,
    )
    types_2d = types_padded.reshape(rows_padded, _LANES)

    kernel = _composition_kernel_factory(int(n_types), int(n_targets))

    out = pl.pallas_call(
        kernel,
        out_shape=jax.ShapeDtypeStruct((n_targets, rows_padded, _LANES), jnp.float32),
        grid_spec=pltpu.PrefetchScalarGridSpec(
            num_scalar_prefetch=2,  # atomic_types, weights -> SMEM
            grid=(n_tiles,),
            in_specs=[
                pl.BlockSpec((tile_rows, _LANES), lambda r, at, w: (r, 0)),
            ],
            out_specs=pl.BlockSpec(
                (n_targets, tile_rows, _LANES), lambda r, at, w: (0, r, 0)
            ),
        ),
        compiler_params=pltpu.CompilerParams(
            # atom-tile axis is independent -> megacore-shard it on v7x.
            dimension_semantics=("parallel",),
        ),
    )(atomic_types.astype(jnp.int32), weights.astype(jnp.float32), types_2d)

    out_flat = out.reshape(n_targets, n_pad)
    if return_padded:
        return out_flat  # consumer slices lazily / works on the padded slab
    return out_flat[:, :n_atoms]


def composition_forward_per_system(per_atom_values, system_ids, n_systems):
    """Glue for outputs with per_atom=False: sum atom contributions per system."""
    # per_atom_values: [T, N]; system_ids: [N]
    # TODO(synk): fuse this reduction into the kernel epilogue for
    # per_atom=False targets to avoid writing/re-reading the full [T, N] slab;
    # metatensor TensorMap/Labels bookkeeping (samples, properties,
    # selected_atoms slicing) has no Pallas equivalent and stays host-side.
    return jax.vmap(
        lambda v: jax.ops.segment_sum(v, system_ids, num_segments=n_systems)
    )(per_atom_values)


if __name__ == "__main__":
    key = jax.random.PRNGKey(0)

    # Synthetic CompositionModel setup: 3 atomic types, 2 energy targets.
    atomic_types = jnp.array([1, 6, 8], dtype=jnp.int32)      # e.g. H, C, O
    n_types = atomic_types.shape[0]
    n_targets = 2

    # Deterministic composition weights (the `weights` buffer, shape [T, K]).
    k_w, k_t1, k_t2 = jax.random.split(key, 3)
    weights = jax.random.normal(k_w, (n_targets, n_types), dtype=jnp.float32)

    # Two "systems" with 7 and 9 atoms; types drawn from the known species.
    n1, n2 = 7, 9
    types_sys1 = atomic_types[jax.random.randint(k_t1, (n1,), 0, n_types)]
    types_sys2 = atomic_types[jax.random.randint(k_t2, (n2,), 0, n_types)]
    concatenated_types = jnp.concatenate([types_sys1, types_sys2])
    system_ids = jnp.concatenate(
        [jnp.zeros((n1,), jnp.int32), jnp.ones((n2,), jnp.int32)]
    )

    # Run the Pallas kernel (per-atom predictions, one row per target).
    per_atom = composition_forward(concatenated_types, atomic_types, weights)
    per_atom = jax.block_until_ready(per_atom)

    # Also exercise the per-structure reduction path (per_atom=False targets).
    per_system = jax.block_until_ready(
        composition_forward_per_system(per_atom, system_ids, 2)
    )

    # Reference check in plain JAX: gather weights by species index.
    type_idx = jnp.argmax(
        concatenated_types[:, None] == atomic_types[None, :], axis=1
    )
    ref = weights[:, type_idx]                                  # [T, N]
    assert per_atom.shape == (n_targets, n1 + n2)
    assert jnp.allclose(per_atom, ref, atol=1e-6)
    ref_sys = jax.vmap(
        lambda v: jax.ops.segment_sum(v, system_ids, num_segments=2)
    )(ref)
    assert jnp.allclose(per_system, ref_sys, atol=1e-5)

    print("KERNEL_OK")
</pallas_src>

<mosaic_0001>
module attributes {stable_mosaic.version = 11 : i64} {
  func.func @kernel(%arg0: i32, %arg1: memref<3xi32, #tpu.memory_space<smem>>, %arg2: memref<2x3xf32, #tpu.memory_space<smem>>, %arg3: memref<16x128xi16, #tpu.memory_space<vmem>>, %arg4: memref<2x16x128xf32, #tpu.memory_space<vmem>>) attributes {dimension_semantics = [#tpu.dimension_semantics<parallel>], iteration_bounds = array<i64: 1>, scalar_prefetch = 2 : i64, scratch_operands = 0 : i64, tpu.core_type = #tpu.core_type<tc>, window_params = [{transform_indices = @transform_0, window_bounds = array<i64: 16, 128>}, {transform_indices = @transform_1, window_bounds = array<i64: 2, 16, 128>}]} {
    %c0 = arith.constant 0 : index
    %c0_0 = arith.constant 0 : index
    %0 = vector.load %arg3[%c0, %c0_0] : memref<16x128xi16, #tpu.memory_space<vmem>>, vector<16x128xi16>
    %1 = arith.extsi %0 : vector<16x128xi16> to vector<16x128xi32>
    %c0_1 = arith.constant 0 : index
    %2 = memref.load %arg1[%c0_1] : memref<3xi32, #tpu.memory_space<smem>>
    %3 = vector.broadcast %2 : i32 to vector<16x128xi32>
    %4 = arith.cmpi eq, %1, %3 : vector<16x128xi32>
    %c1 = arith.constant 1 : index
    %5 = memref.load %arg1[%c1] : memref<3xi32, #tpu.memory_space<smem>>
    %6 = vector.broadcast %5 : i32 to vector<16x128xi32>
    %7 = arith.cmpi eq, %1, %6 : vector<16x128xi32>
    %c2 = arith.constant 2 : index
    %8 = memref.load %arg1[%c2] : memref<3xi32, #tpu.memory_space<smem>>
    %9 = vector.broadcast %8 : i32 to vector<16x128xi32>
    %10 = arith.cmpi eq, %1, %9 : vector<16x128xi32>
    %cst = arith.constant 0.000000e+00 : f32
    %11 = vector.broadcast %cst : f32 to vector<16x128xf32>
    %c0_2 = arith.constant 0 : index
    %c0_3 = arith.constant 0 : index
    %12 = memref.load %arg2[%c0_2, %c0_3] : memref<2x3xf32, #tpu.memory_space<smem>>
    %13 = vector.broadcast %12 : f32 to vector<16x128xf32>
    %14 = arith.select %4, %13, %11 : vector<16x128xi1>, vector<16x128xf32>
    %c0_4 = arith.constant 0 : index
    %c1_5 = arith.constant 1 : index
    %15 = memref.load %arg2[%c0_4, %c1_5] : memref<2x3xf32, #tpu.memory_space<smem>>
    %16 = vector.broadcast %15 : f32 to vector<16x128xf32>
    %17 = arith.select %7, %16, %11 : vector<16x128xi1>, vector<16x128xf32>
    %c0_6 = arith.constant 0 : index
    %c2_7 = arith.constant 2 : index
    %18 = memref.load %arg2[%c0_6, %c2_7] : memref<2x3xf32, #tpu.memory_space<smem>>
    %19 = vector.broadcast %18 : f32 to vector<16x128xf32>
    %20 = arith.select %10, %19, %11 : vector<16x128xi1>, vector<16x128xf32>
    %21 = arith.addf %14, %17 : vector<16x128xf32>
    %22 = arith.addf %21, %20 : vector<16x128xf32>
    %c0_8 = arith.constant 0 : index
    %c0_9 = arith.constant 0 : index
    %c0_10 = arith.constant 0 : index
    %23 = vector.load %arg4[%c0_8, %c0_9, %c0_10] : memref<2x16x128xf32, #tpu.memory_space<vmem>>, vector<1x16x128xf32>
    %24 = vector.shape_cast %23 : vector<1x16x128xf32> to vector<16x128xf32>
    %25 = vector.shape_cast %22 : vector<16x128xf32> to vector<1x16x128xf32>
    tpu.vector_store %arg4[%c0_8, %c0_9, %c0_10], %25 {strides = array<i32>} : memref<2x16x128xf32, #tpu.memory_space<vmem>>, vector<1x16x128xf32>,
    %c1_11 = arith.constant 1 : index
    %c0_12 = arith.constant 0 : index
    %26 = memref.load %arg2[%c1_11, %c0_12] : memref<2x3xf32, #tpu.memory_space<smem>>
    %27 = vector.broadcast %26 : f32 to vector<16x128xf32>
    %28 = arith.select %4, %27, %11 : vector<16x128xi1>, vector<16x128xf32>
    %c1_13 = arith.constant 1 : index
    %c1_14 = arith.constant 1 : index
    %29 = memref.load %arg2[%c1_13, %c1_14] : memref<2x3xf32, #tpu.memory_space<smem>>
    %30 = vector.broadcast %29 : f32 to vector<16x128xf32>
    %31 = arith.select %7, %30, %11 : vector<16x128xi1>, vector<16x128xf32>
    %c1_15 = arith.constant 1 : index
    %c2_16 = arith.constant 2 : index
    %32 = memref.load %arg2[%c1_15, %c2_16] : memref<2x3xf32, #tpu.memory_space<smem>>
    %33 = vector.broadcast %32 : f32 to vector<16x128xf32>
    %34 = arith.select %10, %33, %11 : vector<16x128xi1>, vector<16x128xf32>
    %35 = arith.addf %28, %31 : vector<16x128xf32>
    %36 = arith.addf %35, %34 : vector<16x128xf32>
    %c1_17 = arith.constant 1 : index
    %c0_18 = arith.constant 0 : index
    %c0_19 = arith.constant 0 : index
    %37 = vector.load %arg4[%c1_17, %c0_18, %c0_19] : memref<2x16x128xf32, #tpu.memory_space<vmem>>, vector<1x16x128xf32>
    %38 = vector.shape_cast %37 : vector<1x16x128xf32> to vector<16x128xf32>
    %39 = vector.shape_cast %36 : vector<16x128xf32> to vector<1x16x128xf32>
    tpu.vector_store %arg4[%c1_17, %c0_18, %c0_19], %39 {strides = array<i32>} : memref<2x16x128xf32, #tpu.memory_space<vmem>>, vector<1x16x128xf32>,
    return
  }
  func.func @transform_0(%arg0: i32, %arg1: memref<3xi32, #tpu.memory_space<smem>>, %arg2: memref<2x3xf32, #tpu.memory_space<smem>>) -> (i32, i32) {
    %c0_i32 = arith.constant 0 : i32
    %c0_i32_0 = arith.constant 0 : i32
    return %arg0, %c0_i32 : i32, i32
  }
  func.func @transform_1(%arg0: i32, %arg1: memref<3xi32, #tpu.memory_space<smem>>, %arg2: memref<2x3xf32, #tpu.memory_space<smem>>) -> (i32, i32, i32) {
    %c0_i32 = arith.constant 0 : i32
    %c0_i32_0 = arith.constant 0 : i32
    %c0_i32_1 = arith.constant 0 : i32
    return %c0_i32, %arg0, %c0_i32_0 : i32, i32, i32
  }
}

</mosaic_0001>

<bundles_post_ra>
// kernel: tpu_custom_call.1
= control target key start
LH: loop header
LB: loop body
LE: loop exit
PB: predicated region body
PF: predicated region fallthrough
CT: control target
= control target key end

     0   :  { %s182_s12 = smov [#allocation3]   ;;  %s183_s15 = smov [#allocation4]   ;;  %s276_s0 = inlined_call_operand.hbm [shape: s32[3], index: 0, kind: input, shape index: {}]   ;;  %s277_s2 = inlined_call_operand.hbm [shape: s16[16,128], index: 2, kind: input, shape index: {}]   ;;  %s278_s3 = inlined_call_operand.hbm [shape: f32[2,16,128], index: 3, kind: output, shape index: {}]   ;;  %s279_s1 = inlined_call_operand.hbm [shape: f32[2,3], index: 1, kind: input, shape index: {}]  }
   0x1   :  { %9 = dma.hbm_to_smem %s276_s0, 16, %s182_s12, [#allocation2] }
   0x2   :  { %11 = dma.hbm_to_smem %s279_s1, 32, %s183_s15, [#allocation2] }
   0x3   :  { %176 = dma.done.wait [#allocation2], 48 }
   0x4   :  { %177 = vsyncadd [#allocation2], 4294967248 }
   0x5   :  { %13 = sfence }
   0x6   :  { %14 = vsyncpa [#allocation6], 0 }
   0x7   :  { %15 = vsyncpa [#allocation7], 0  ;;  %s184_s18 = smov [#allocation5]  }
   0x8   :  { %s21_s19 = sshll.u32 %s184_s18, 4  ;;  %s22_s19 = int_to_ptr.vmem [resolvable:$true] %s21_s19 }
   0x9   :  { %s144_s20 = scalar_lea.vmem %s22_s19, 128  ;;  %p149_p1 = scmp.lt.s32.totalorder %s22_s19, %s22_s19 }
   0xa   :  { %p145_p0 = scmp.ne.s32.totalorder %s22_s19, %s144_s20  ;;  %p150_p2 = scmp.lt.s32.totalorder %s144_s20, %s144_s20 }
   0xc   :  { %p151_p3 = por %p150_p2, %p149_p1 }
   0xe   :  { %p152_p4 = pnand %p151_p3, %p145_p0 }
  0x10   :  { %155 = shalt.err (!%p152_p4)
}
  0x11   :  { %s185_s0 = smov 64   ;;  %s186_s21 = smov 4  }
  0x12   :  { %27 = dma.hbm_to_vmem [thread:$0]  %s277_s2, 128, %s22_s19, [#allocation6], %s185_s0, %s185_s0, %s186_s21  }
  0x13   :  { %178 = dma.done.wait [#allocation6], 128  }
  0x14   :  { %179 = vsyncadd [#allocation6], 4294967168  ;;  %s35_s1 = sld [smem:[#allocation3]]  ;;  %v109_v0 = vld [vmem:[#allocation5] sm:$0xff]   ;;  %s187_s2 = smov [#allocation8]  }
  0x15   :  { %s101_s24 = sld [smem:[#allocation3 + $0x1]]  ;;  %v110_v2 = vunpack.c.l.b16 %v109_v0  ;;  %v111_v4 = vunpack.c.h.b16 %v109_v0  ;;  %s89_s5 = sshll.u32 %s187_s2, 4  ;;  %s90_s5 = int_to_ptr.vmem [resolvable:$true] %s89_s5 }
  0x16   :  { %s102_s25 = sld [smem:[#allocation3 + $0x2]]  ;;  %s156_s6 = scalar_lea.vmem %s90_s5, 512 }
  0x17   :  { %s47_s26 = sld [smem:[#allocation4]]  ;;  %p157_p5 = scmp.ne.s32.totalorder %s90_s5, %s156_s6 }
  0x18   :  { %s103_s27 = sld [smem:[#allocation4 + $0x1]]  ;;  %p161_p6 = scmp.lt.s32.totalorder %s90_s5, %s90_s5 }
  0x19   :  { %s104_s28 = sld [smem:[#allocation4 + $0x2]]  ;;  %p162_p7 = scmp.lt.s32.totalorder %s156_s6, %s156_s6 }
  0x1a   :  { %v36_v1 = vstv %s35_s1  ;;  %s219_s29 = sld [smem:[#allocation4 + $0x80]] }
  0x1b   :  { %v40_v3 = vstv %s101_s24  ;;  %s221_s30 = sld [smem:[#allocation4 + $0x81]]  ;;  %vm223_vm0 = vcmp.eq.s32.totalorder %v110_v2, %v36_v1  ;;  %vm237_vm3 = vcmp.eq.s32.totalorder %v111_v4, %v36_v1  ;;  %p163_p8 = por %p162_p7, %p161_p6 }
  0x1c   :  { %v44_v5 = vstv %s102_s25  ;;  %s107_s4 = sld [smem:[#allocation4 + $0x82]]  ;;  %vm227_vm1 = vcmp.eq.s32.totalorder %v110_v2, %v40_v3  ;;  %vm241_vm4 = vcmp.eq.s32.totalorder %v111_v4, %v40_v3 }
  0x1d   :  { %vm231_vm2 = vcmp.eq.s32.totalorder %v110_v2, %v44_v5  ;;  %v48_v9 = vstv %s47_s26  ;;  %vm247_vm5 = vcmp.eq.s32.totalorder %v111_v4, %v44_v5  ;;  %p164_p9 = pnand %p163_p8, %p157_p5 }
  0x1e   :  { %v49_v10 = vsel %vm223_vm0, %v48_v9, 0.0  ;;  %v52_v11 = vstv %s103_s27  ;;  %v50_v17 = vsel %vm237_vm3, %v48_v9, 0.0 }
  0x1f   :  { %v53_v14 = vsel %vm227_vm1, %v52_v11, 0.0  ;;  %v56_v15 = vstv %s104_s28  ;;  %v54_v20 = vsel %vm241_vm4, %v52_v11, 0.0 }
  0x20   :  { %v57_v18 = vsel %vm231_vm2, %v56_v15, 0.0  ;;  %v59_v19 = vadd.f32 %v53_v14, %v49_v10  ;;  %v58_v21 = vsel %vm247_vm5, %v56_v15, 0.0  ;;  %v60_v22 = vadd.f32 %v54_v20, %v50_v17 }
  0x21   :  { %v66_v23 = vstv %s219_s29  ;;  %v70_v24 = vstv %s221_s30 }
  0x22   :  { %v61_v25 = vadd.f32 %v59_v19, %v57_v18  ;;  %v67_v26 = vsel %vm223_vm0, %v66_v23, 0.0  ;;  %v71_v27 = vsel %vm227_vm1, %v70_v24, 0.0  ;;  %v74_v28 = vstv %s107_s4 }
  0x23   :  { %v62_v29 = vadd.f32 %v60_v22, %v58_v21  ;;  %v75_v30 = vsel %vm231_vm2, %v74_v28, 0.0  ;;  %v77_v31 = vadd.f32 %v71_v27, %v67_v26  ;;  %v68_v32 = vsel %vm237_vm3, %v66_v23, 0.0 }
  0x24   :  { %63 = vst [vmem:[#allocation8] sm:$0xff] %v61_v25  ;;  %v72_v33 = vsel %vm241_vm4, %v70_v24, 0.0  ;;  %v76_v34 = vsel %vm247_vm5, %v74_v28, 0.0 }
  0x25   :  { %64 = vst [vmem:[#allocation8 + $0x8] sm:$0xff] %v62_v29  ;;  %v79_v35 = vadd.f32 %v77_v31, %v75_v30  ;;  %v78_v36 = vadd.f32 %v72_v33, %v68_v32 }
  0x27   :  { %82 = vst [vmem:[#allocation8 + $0x10] sm:$0xff] %v79_v35  ;;  %v80_v37 = vadd.f32 %v78_v36, %v76_v34 }
  0x29   :  { %83 = vst [vmem:[#allocation8 + $0x18] sm:$0xff] %v80_v37 }
  0x2a   :  { %167 = shalt.err (!%p164_p9)
}
  0x2b   :  { %s188_s7 = smov 128   ;;  %s189_s8 = smov 8  }
  0x2c   :  { %95 = dma.vmem_to_hbm [thread:$0]  %s90_s5, 512, %s278_s3, [#allocation7], %s188_s7, %s188_s7, %s189_s8  }
  0x2d   :  { %180 = dma.done.wait [#allocation7], 512  }
  0x2e   :  { %181 = vsyncadd [#allocation7], 4294966784 }
  0x2f   :  { %99 = vsyncpa [#allocation6], 1 }
  0x30   :  { %100 = vsyncpa [#allocation7], 1 }

</bundles_post_ra>
